<compile_context>
chip_gen: v5e
topology: v5e:2x2
jax: 0.10.0
libtpu: 0.0.40
codegen_flags: <defaults>
</compile_context>

<pallas_src>
import functools

import numpy as np
import jax
import jax.numpy as jnp
from jax.experimental import pallas as pl
from jax.experimental.pallas import tpu as pltpu


def _netcontpdg6_kernel(x_ref, w1_ref, wmu_ref, b_ref, mu_ref):
    # x_ref:   VMEM [TB, NIN]   bf16  raw (unmasked) input tile
    # w1_ref:  VMEM [NIN, H]    bf16  folded fc1 weight (mask+norm+concat+T+2.0 folded)
    # wmu_ref: VMEM [H, NOUT]   bf16  0.5 * fc_mu.weight^T
    # b_ref:   VMEM [1, NOUT]   f32   0.5 * sum_h fc_mu.weight^T[h, :]
    # mu_ref:  VMEM [TB, NOUT]  f32
    h = jnp.dot(x_ref[...], w1_ref[...], preferred_element_type=jnp.float32)   # MXU, f32 acc
    t = jnp.tanh(h)                                                            # EUP, f32
    mu = jnp.dot(t.astype(jnp.bfloat16), wmu_ref[...],
                 preferred_element_type=jnp.float32)                           # MXU
    mu_ref[...] = jnp.maximum(mu + b_ref[...], 0.0)                            # bias + relu


def prepare_netcontpdg6_params(w1, w_mu, keep_idx, ftr_normalizer, nin):
    """One-time weight folding (call at init / model load; static across forwards).

    Returns (w1_eff_bf16 [nin, H], wmu_half_bf16 [H, nout], bias_f32 [1, nout]).
    """
    w1 = jnp.asarray(w1, jnp.float32)                       # [H, 2*D]
    w_mu = jnp.asarray(w_mu, jnp.float32)                   # [NOUT, H]
    norm = jnp.asarray(ftr_normalizer, jnp.float32)         # [D]
    keep_idx = jnp.asarray(keep_idx, jnp.int32)             # [D]
    H, two_d = w1.shape
    D = two_d // 2
    # mask gather + normalizer + [x,-x] concat + transpose + 2.0 pre-tanh scale:
    w1_fold = 2.0 * (w1[:, :D] - w1[:, D:]).T * norm[:, None]            # [D, H]
    w1_eff = jnp.zeros((nin, H), jnp.float32).at[keep_idx].set(w1_fold)  # [NIN, H]
    # 0.5 + 0.5*tanh affine folded into fc_mu:
    wmu_t = w_mu.T                                                       # [H, NOUT]
    wmu_half = 0.5 * wmu_t
    bias = 0.5 * jnp.sum(wmu_t, axis=0, keepdims=True)                   # [1, NOUT]
    return (w1_eff.astype(jnp.bfloat16),
            wmu_half.astype(jnp.bfloat16),
            bias.astype(jnp.float32))


@functools.partial(jax.jit, static_argnames=("tile_b",))
def netcontpdg6_forward(x, w1_eff, wmu_half, bias, *, tile_b=4096):
    """Returns (mu, sig): the parameters of the MultivariateNormal that
    NetContPDG6.forward constructs.  (The `eps` argument of the PyTorch forward
    is unused by it, so it is intentionally omitted here.)"""
    # TODO(synk): the MultivariateNormal distribution object itself is not compute;
    # the (mu, sig) pair fully parameterizes it.
    x = jnp.asarray(x, jnp.float32)
    B, NIN = x.shape
    _, H = w1_eff.shape
    NOUT = wmu_half.shape[1]

    x = x.astype(jnp.bfloat16)          # bf16 stream of the dominant HBM read

    # ---- batch tile selection ----
    tile_b = int(min(tile_b, 8192))     # VMEM cap (safe vs. v5e 16 MiB scoped default)
    if tile_b >= B:
        if B >= 64:
            # split so a v7x megacore (2 TensorCores) gets >= 2 parallel grid steps
            half = (((B + 1) // 2) + 15) // 16 * 16
            tile_b = min(half, B)
        else:
            tile_b = B                  # single full-extent block (no multiple-of-16 need)
    else:
        tile_b = max(16, (tile_b // 16) * 16)   # bf16 sublane packing
    grid = (pl.cdiv(B, tile_b),)        # ragged last tile handled by Pallas masking

    cost = pl.CostEstimate(
        flops=2 * B * NIN * H + 2 * B * H * NOUT,
        transcendentals=B * H,
        bytes_accessed=B * NIN * 2 + B * NOUT * 4 + NIN * H * 2 + H * NOUT * 2 + NOUT * 4,
    )

    mu = pl.pallas_call(
        _netcontpdg6_kernel,
        out_shape=jax.ShapeDtypeStruct((B, NOUT), jnp.float32),
        grid=grid,
        in_specs=[
            pl.BlockSpec((tile_b, NIN), lambda i: (i, 0)),   # streamed x tiles (bf16)
            pl.BlockSpec((NIN, H), lambda i: (0, 0)),        # resident folded W1 (bf16)
            pl.BlockSpec((H, NOUT), lambda i: (0, 0)),       # resident 0.5*Wmu^T (bf16)
            pl.BlockSpec((1, NOUT), lambda i: (0, 0)),       # resident bias (f32)
        ],
        out_specs=pl.BlockSpec((tile_b, NOUT), lambda i: (i, 0)),
        compiler_params=pltpu.CompilerParams(
            dimension_semantics=("parallel",),
            vmem_limit_bytes=32 * 1024 * 1024),
        cost_estimate=cost,
    )(x, w1_eff, wmu_half, bias)

    sig = jnp.full((B, NOUT), 0.1, jnp.float32)   # self.stdmax broadcast over the batch
    return mu, sig


def _reference_forward(x, w1, w_mu, keep_idx, ftr_normalizer):
    """Pure-JAX f32 reference of the PyTorch forward (for the sanity check)."""
    x_ = x[:, keep_idx] * ftr_normalizer
    x_symm = jnp.concatenate([x_, -x_], axis=1)
    z1 = 0.5 + 0.5 * jnp.tanh(2.0 * (x_symm @ w1.T))
    return jnp.maximum(z1 @ w_mu.T, 0.0)


if __name__ == "__main__":
    key = jax.random.PRNGKey(0)
    B, NIN, H, NOUT = 32, 16, 128, 2
    masked_ftrs = [2, 5]                                   # features to drop
    keep_idx = np.array([i for i in range(NIN) if i not in masked_ftrs], dtype=np.int32)
    D = len(keep_idx)                                      # nin after masking = 14

    kx, k1, k2 = jax.random.split(key, 3)
    x = jax.random.normal(kx, (B, NIN), dtype=jnp.float32)
    # fc1.weight: Linear(2*D, H, bias=False)   (sparse_ init approximated by dense normal)
    w1 = 0.5 * jax.random.normal(k1, (H, 2 * D), dtype=jnp.float32)
    # fc_mu.weight: Linear(H, NOUT, bias=False), ~Normal(0.5/H, 0.001)
    w_mu = 0.5 / H + 0.001 * jax.random.normal(k2, (NOUT, H), dtype=jnp.float32)
    ftr_normalizer = np.linspace(0.5, 1.5, D).astype(np.float32)

    # one-time folding (static across inference calls)
    params = jax.block_until_ready(
        prepare_netcontpdg6_params(w1, w_mu, keep_idx, ftr_normalizer, NIN))

    # default path (single full-batch tile) and an explicitly tiled path (grid=2)
    mu, sig = netcontpdg6_forward(x, *params)
    mu2, _ = netcontpdg6_forward(x, *params, tile_b=16)
    jax.block_until_ready((mu, sig, mu2))

    # sanity checks against the pure-JAX f32 reference and module invariants
    ref_mu = _reference_forward(x, w1, w_mu, keep_idx, jnp.asarray(ftr_normalizer))
    assert mu.shape == (B, NOUT) and sig.shape == (B, NOUT)
    assert bool(jnp.all(mu >= 0.0))                         # relu output
    assert bool(jnp.all(sig == jnp.float32(0.1)))           # constant stdmax
    assert bool(jnp.allclose(mu, ref_mu, rtol=2e-2, atol=2e-2))
    assert bool(jnp.allclose(mu2, ref_mu, rtol=2e-2, atol=2e-2))
    print("KERNEL_OK")
</pallas_src>

<mosaic_0001>
module attributes {stable_mosaic.version = 11 : i64} {
  func.func @_netcontpdg6_kernel(%arg0: i32, %arg1: memref<32x16xbf16, #tpu.memory_space<vmem>>, %arg2: memref<16x128xbf16, #tpu.memory_space<vmem>>, %arg3: memref<128x2xbf16, #tpu.memory_space<vmem>>, %arg4: memref<1x2xf32, #tpu.memory_space<vmem>>, %arg5: memref<32x2xf32, #tpu.memory_space<vmem>>) attributes {dimension_semantics = [#tpu.dimension_semantics<parallel>], iteration_bounds = array<i64: 1>, scalar_prefetch = 0 : i64, scratch_operands = 0 : i64, tpu.core_type = #tpu.core_type<tc>, window_params = [{transform_indices = @transform_0, window_bounds = array<i64: 32, 16>}, {pipeline_mode = #tpu.pipeline_mode<synchronous>, transform_indices = @transform_1, window_bounds = array<i64: 16, 128>}, {pipeline_mode = #tpu.pipeline_mode<synchronous>, transform_indices = @transform_2, window_bounds = array<i64: 128, 2>}, {pipeline_mode = #tpu.pipeline_mode<synchronous>, transform_indices = @transform_3, window_bounds = array<i64: 1, 2>}, {transform_indices = @transform_4, window_bounds = array<i64: 32, 2>}]} {
    %c0 = arith.constant 0 : index
    %c0_0 = arith.constant 0 : index
    %0 = vector.load %arg1[%c0, %c0_0] : memref<32x16xbf16, #tpu.memory_space<vmem>>, vector<32x16xbf16>
    %c0_1 = arith.constant 0 : index
    %c0_2 = arith.constant 0 : index
    %1 = vector.load %arg2[%c0_1, %c0_2] : memref<16x128xbf16, #tpu.memory_space<vmem>>, vector<16x128xbf16>
    %cst = arith.constant dense<0.000000e+00> : vector<32x128xf32>
    %2 = tpu.matmul %0, %1, %cst {dimension_numbers = #tpu.dot_dimension_numbers<[1], [0], [0], [1], [0, 0, 1, 1], [], []>} : vector<32x16xbf16>, vector<16x128xbf16>, vector<32x128xf32> -> vector<32x128xf32>
    %3 = math.tanh %2 : vector<32x128xf32>
    %4 = arith.truncf %3 : vector<32x128xf32> to vector<32x128xbf16>
    %c0_3 = arith.constant 0 : index
    %c0_4 = arith.constant 0 : index
    %5 = vector.load %arg3[%c0_3, %c0_4] : memref<128x2xbf16, #tpu.memory_space<vmem>>, vector<128x2xbf16>
    %cst_5 = arith.constant dense<0.000000e+00> : vector<32x2xf32>
    %6 = tpu.matmul %4, %5, %cst_5 {dimension_numbers = #tpu.dot_dimension_numbers<[1], [0], [0], [1], [0, 0, 1, 1], [], []>} : vector<32x128xbf16>, vector<128x2xbf16>, vector<32x2xf32> -> vector<32x2xf32>
    %c0_6 = arith.constant 0 : index
    %c0_7 = arith.constant 0 : index
    %7 = vector.load %arg4[%c0_6, %c0_7] : memref<1x2xf32, #tpu.memory_space<vmem>>, vector<1x2xf32>
    %8 = vector.broadcast %7 : vector<1x2xf32> to vector<32x2xf32>
    %9 = arith.addf %6, %8 : vector<32x2xf32>
    %cst_8 = arith.constant 0.000000e+00 : f32
    %10 = vector.broadcast %cst_8 : f32 to vector<32x2xf32>
    %11 = arith.maximumf %9, %10 : vector<32x2xf32>
    %c0_9 = arith.constant 0 : index
    %c0_10 = arith.constant 0 : index
    %12 = vector.load %arg5[%c0_9, %c0_10] : memref<32x2xf32, #tpu.memory_space<vmem>>, vector<32x2xf32>
    tpu.vector_store %arg5[%c0_9, %c0_10], %11 {strides = array<i32>} : memref<32x2xf32, #tpu.memory_space<vmem>>, vector<32x2xf32>,
    return
  }
  func.func @transform_0(%arg0: i32) -> (i32, i32) {
    %c0_i32 = arith.constant 0 : i32
    %c0_i32_0 = arith.constant 0 : i32
    return %arg0, %c0_i32 : i32, i32
  }
  func.func @transform_1(%arg0: i32) -> (i32, i32) {
    %c0_i32 = arith.constant 0 : i32
    %c0_i32_0 = arith.constant 0 : i32
    %c0_i32_1 = arith.constant 0 : i32
    return %c0_i32, %c0_i32_0 : i32, i32
  }
  func.func @transform_2(%arg0: i32) -> (i32, i32) {
    %c0_i32 = arith.constant 0 : i32
    %c0_i32_0 = arith.constant 0 : i32
    %c0_i32_1 = arith.constant 0 : i32
    return %c0_i32, %c0_i32_0 : i32, i32
  }
  func.func @transform_3(%arg0: i32) -> (i32, i32) {
    %c0_i32 = arith.constant 0 : i32
    %c0_i32_0 = arith.constant 0 : i32
    %c0_i32_1 = arith.constant 0 : i32
    return %c0_i32, %c0_i32_0 : i32, i32
  }
  func.func @transform_4(%arg0: i32) -> (i32, i32) {
    %c0_i32 = arith.constant 0 : i32
    %c0_i32_0 = arith.constant 0 : i32
    return %arg0, %c0_i32 : i32, i32
  }
}

</mosaic_0001>

<bundles_post_ra>
// kernel: netcontpdg6_forward.1
= control target key start
LH: loop header
LB: loop body
LE: loop exit
PB: predicated region body
PF: predicated region fallthrough
CT: control target
= control target key end

     0   :  { %vm40_vm0 = vcmask 130048   ;;  %vm163_vm1 = vcmask 15360   ;;  %s319_s1 = inlined_call_operand.vmem [shape: bf16[16,128], index: 1, kind: input, shape index: {}]   ;;  %s320_s0 = inlined_call_operand.vmem [shape: bf16[32,16], index: 0, kind: input, shape index: {}]   ;;  %s321_s2 = inlined_call_operand.vmem [shape: bf16[128,2], index: 2, kind: input, shape index: {}]   ;;  %s322_s3 = inlined_call_operand.vmem [shape: f32[1,2], index: 3, kind: input, shape index: {}]   ;;  %s323_s4 = inlined_call_operand.vmem [shape: f32[32,2], index: 4, kind: output, shape index: {}]  }
   0x1   :  { %v220_v0 = vld [vmem:[%s319_s1] sm:$0xff]  ;;  %v228_v2 = vld [vmem:[%s321_s2 + $0x38] sm:$0xff]  ;;  %v227_v3 = vld [vmem:[%s321_s2 + $0x30] sm:$0xff] }
   0x2   :  { %v218_v1 = vld [vmem:[%s320_s0] sm:$0xff]  ;;  %54 = vmatpush.bf16.msra.mxu0 %v220_v0  ;;  %140 = vmatpush.bf16.msra.mxu1 %v228_v2  ;;  %v226_v4 = vld [vmem:[%s321_s2 + $0x28] sm:$0xff]  ;;  %v224_v7 = vld [vmem:[%s321_s2 + $0x18] sm:$0xff] }
   0x3   :  { %229 = vmatpush.bf16.msra.mxu2 %v228_v2  ;;  %v225_v5 = vld [vmem:[%s321_s2 + $0x20] sm:$0xff]  ;;  %v219_v6 = vld [vmem:[%s320_s0 + $0x8] sm:$0xff]  ;;  %v223_v8 = vld [vmem:[%s321_s2 + $0x10] sm:$0xff] }
   0x4   :  { %v222_v9 = vld [vmem:[%s321_s2 + $0x8] sm:$0xff]  ;;  %v221_v10 = vld [vmem:[%s321_s2] sm:$0xff] }
   0x5   :  { %184 = vmatmul.msk.bf16.vlgmr.msra.gmra.mxu0 %vm40_vm0, %v218_v1  ;;  %v237_v21 = vld [vmem:[%s322_s3] ss:$0 sm:$0xff] }
   0x6   :  { %141 = vmatpush.bf16.msra.mxu1 %v227_v3 }
   0x7   :  { %230 = vmatpush.bf16.msra.mxu2 %v227_v3 }
   0xa   :  { %142 = vmatpush.bf16.msra.mxu1 %v226_v4 }
   0xb   :  { %231 = vmatpush.bf16.msra.mxu2 %v226_v4 }
   0xe   :  { %143 = vmatpush.bf16.msra.mxu1 %v225_v5 }
   0xf   :  { %232 = vmatpush.bf16.msra.mxu2 %v225_v5 }
  0x12   :  { %144 = vmatpush.bf16.msra.mxu1 %v224_v7 }
  0x13   :  { %233 = vmatpush.bf16.msra.mxu2 %v224_v7 }
  0x15   :  { %185 = vmatmul.msk.bf16.gmra.mxu0 %vm40_vm0, %v219_v6 }
  0x16   :  { %145 = vmatpush.bf16.msra.mxu1 %v223_v8 }
  0x17   :  { %234 = vmatpush.bf16.msra.mxu2 %v223_v8 }
  0x1a   :  { %146 = vmatpush.bf16.msra.mxu1 %v222_v9 }
  0x1b   :  { %235 = vmatpush.bf16.msra.mxu2 %v222_v9 }
  0x1e   :  { %147 = vmatpush.bf16.msra.mxu1 %v221_v10 }
  0x1f   :  { %236 = vmatpush.bf16.msra.mxu2 %v221_v10 }
  0x82   :  { %v56_v11 = vpop.f32.mrf.mxu0 }
  0x83   :  { %238 = vtanh.f32 %v56_v11 }
  0x89   :  { %v239_v13 = vpop.eup %238 }
  0x8a   :  { %v58_v12 = vpop.f32.mrf.mxu0 }
  0x8b   :  { %240 = vtanh.f32 %v58_v12 }
  0x91   :  { %v241_v14 = vpop.eup %240 }
  0x92   :  { %v61_v15 = vpop.f32.mrf.mxu0  ;;  %v70_v16 = vpack.c.bf16 %v241_v14, %v239_v13 }
  0x93   :  { %242 = vtanh.f32 %v61_v15 }
  0x94   :  { %148 = vmatmul.bf16.vlgmr.msra.gmra.mxu1 %v70_v16 }
  0x99   :  { %v243_v18 = vpop.eup %242 }
  0x9a   :  { %v63_v17 = vpop.f32.mrf.mxu0 }
  0x9b   :  { %244 = vtanh.f32 %v63_v17 }
  0xa1   :  { %v245_v19 = vpop.eup %244 }
  0xa2   :  { %v71_v20 = vpack.c.bf16 %v245_v19, %v243_v18 }
  0xa4   :  { %153 = vmatmul.bf16.vlgmr.msra.gmra.mxu2 %v71_v20 }
 0x111   :  { %v149_v22 = vpop.f32.mrf.mxu1 }
 0x112   :  { %v150_v23 = vadd.f32 %v237_v21, %v149_v22 }
 0x114   :  { %v159_v24 = vmax.f32 %v150_v23, 0.0 }
 0x116   :  { %164 = vst.msk [vmem:[%s323_s4] sm:$0xff] %vm163_vm1, %v159_v24 }
 0x119   :  { %v151_v25 = vpop.f32.mrf.mxu1 }
 0x11a   :  { %v152_v26 = vadd.f32 %v237_v21, %v151_v25 }
 0x11c   :  { %v160_v27 = vmax.f32 %v152_v26, 0.0 }
 0x11e   :  { %165 = vst.msk [vmem:[%s323_s4 + $0x8] sm:$0xff] %vm163_vm1, %v160_v27 }
 0x127   :  { %v154_v28 = vpop.f32.mrf.mxu2 }
 0x128   :  { %v155_v29 = vadd.f32 %v237_v21, %v154_v28 }
 0x12a   :  { %v161_v30 = vmax.f32 %v155_v29, 0.0 }
 0x12c   :  { %166 = vst.msk [vmem:[%s323_s4 + $0x10] sm:$0xff] %vm163_vm1, %v161_v30 }
 0x12f   :  { %v156_v31 = vpop.f32.mrf.mxu2 }
 0x130   :  { %v157_v32 = vadd.f32 %v237_v21, %v156_v31 }
 0x132   :  { %v162_v33 = vmax.f32 %v157_v32, 0.0 }
 0x134   :  { %167 = vst.msk [vmem:[%s323_s4 + $0x18] sm:$0xff] %vm163_vm1, %v162_v33 }

</bundles_post_ra>
